<compile_context>
chip_gen: v7x
topology: tpu7x:2x2x1
jax: 0.10.0
libtpu: 0.0.40
codegen_flags: <defaults>
</compile_context>

<pallas_src>
import functools

import jax
import jax.numpy as jnp
from jax.experimental import pallas as pl
from jax.experimental.pallas import tpu as pltpu


def _round_up(a, b):
    return (a + b - 1) // b * b


def _vmem_capacity_bytes():
    try:
        return int(pltpu.get_tpu_info().vmem_capacity_bytes)
    except Exception:
        return 64 << 20  # conservative default (v7x per-TC VMEM)


def _layer_norm_lanes(y, gamma, beta, eps, embed_actual):
    """LayerNorm over the (possibly lane-padded) last axis. Padded lanes of y must be 0."""
    e_pad = y.shape[-1]
    inv_e = 1.0 / float(embed_actual)
    mean = jnp.sum(y, axis=-1, keepdims=True) * inv_e  # padded lanes are exactly zero
    d = y - mean
    if embed_actual != e_pad:
        lane = jax.lax.broadcasted_iota(jnp.int32, y.shape, 1)
        d = jnp.where(lane < embed_actual, d, 0.0)
    var = jnp.sum(d * d, axis=-1, keepdims=True) * inv_e
    return d * jax.lax.rsqrt(var + eps) * gamma + beta


# ---------------------------------------------------------------------------
# Kernels
# ---------------------------------------------------------------------------

def _ffn_single_kernel(x_ref, w1_ref, b1_ref, w2_ref, b2_ref, gamma_ref, beta_ref,
                       o_ref, *, eps, embed_actual):
    """Fast path: all of ff_dim resident, one pass, no accumulator."""
    x_f32 = x_ref[...].astype(jnp.float32)
    h = jnp.dot(x_f32.astype(jnp.bfloat16), w1_ref[...],
                preferred_element_type=jnp.float32)
    h = jnp.maximum(h + b1_ref[...], 0.0)
    y = jnp.dot(h.astype(jnp.bfloat16), w2_ref[...],
                preferred_element_type=jnp.float32)
    y = y + b2_ref[...] + x_f32
    out = _layer_norm_lanes(y, gamma_ref[...], beta_ref[...], eps, embed_actual)
    o_ref[...] = out.astype(o_ref.dtype)


def _ffn_ktiled_kernel(x_ref, w1_ref, b1_ref, w2_ref, b2_ref, gamma_ref, beta_ref,
                       o_ref, acc_ref, xbf_ref, *, eps, embed_actual):
    """ff_dim tiled on grid axis 1 with a resident f32 accumulator."""
    k = pl.program_id(1)
    nk = pl.num_programs(1)

    @pl.when(k == 0)
    def _():
        x_f32 = x_ref[...].astype(jnp.float32)
        # Fold fc2 bias + residual into the accumulator init (removes work from the
        # finalize step, which also carries the LayerNorm reductions).
        acc_ref[...] = x_f32 + b2_ref[...]
        # Hoist the x -> bf16 cast out of the k loop.
        xbf_ref[...] = x_f32.astype(jnp.bfloat16)

    # fc1 chunk: bf16 MXU matmul, f32 accumulation, bias + ReLU.
    h = jnp.dot(xbf_ref[...], w1_ref[...], preferred_element_type=jnp.float32)
    h = jnp.maximum(h + b1_ref[...], 0.0)

    # fc2 partial product over this ff_dim chunk.
    acc_ref[...] += jnp.dot(h.astype(jnp.bfloat16), w2_ref[...],
                            preferred_element_type=jnp.float32)

    @pl.when(k == nk - 1)
    def _():
        out = _layer_norm_lanes(acc_ref[...], gamma_ref[...], beta_ref[...],
                                eps, embed_actual)
        o_ref[...] = out.astype(o_ref.dtype)


# ---------------------------------------------------------------------------
# Tile selection (VMEM-budget aware)
# ---------------------------------------------------------------------------

def _single_pass_vmem_bytes(tm, e_pad, f_pad, in_bytes, out_bytes):
    return (2 * tm * e_pad * in_bytes            # x tile, double-buffered
            + 2 * tm * e_pad * out_bytes         # out tile, double-buffered
            + 2 * 2 * e_pad * f_pad * 2          # w1 + w2 (bf16), double-buffered
            + 2 * (f_pad + 3 * e_pad) * 4        # b1, b2, gamma, beta
            + tm * f_pad * 4                     # fc1 activation temp (f32)
            + 2 * tm * e_pad * 4)                # y / LayerNorm temps headroom


def _ktiled_vmem_bytes(tm, tf, e_pad, in_bytes, out_bytes):
    return (2 * tm * e_pad * in_bytes
            + 2 * tm * e_pad * out_bytes
            + 2 * 2 * e_pad * tf * 2             # w1 + w2 chunks (bf16), double-buffered
            + 2 * (tf + 3 * e_pad) * 4
            + tm * e_pad * 4                     # f32 accumulator scratch
            + tm * e_pad * 2                     # hoisted bf16 x scratch
            + tm * tf * 4                        # fc1 activation temp
            + tm * e_pad * 4)                    # LayerNorm temps headroom


def _select_tiles(M, e_pad, f_pad, in_bytes, out_bytes, vmem_budget, split_rows):
    m8 = _round_up(max(M, 1), 8)
    tm_max = m8
    if split_rows and m8 >= 256:
        # v7x-like: make sure grid[0] >= 2 so both TensorCores get row tiles.
        tm_max = _round_up((m8 + 1) // 2, 8)

    tm_cands = []
    for tm in (1024, 512, 384, 256, 128, 64, 32, 16, 8):
        t = min(tm, tm_max)
        if t not in tm_cands:
            tm_cands.append(t)

    # Fast path first: whole ff_dim resident -> no accumulator, no weight re-streaming.
    for tm in tm_cands:
        if _single_pass_vmem_bytes(tm, e_pad, f_pad, in_bytes, out_bytes) <= vmem_budget:
            return tm, f_pad

    # k-tiled: tm sets weight-stream intensity, so maximize it first; tf only amortizes
    # accumulator RMW and per-step overhead.
    for tm in tm_cands:
        for tf in (1024, 512, 256, 128):
            t_f = min(tf, f_pad)
            if _ktiled_vmem_bytes(tm, t_f, e_pad, in_bytes, out_bytes) <= vmem_budget:
                return tm, t_f
    return 8, 128


# ---------------------------------------------------------------------------
# Wrapper
# ---------------------------------------------------------------------------

def feed_forward(x, w1, b1, w2, b2, gamma, beta, *, eps=1e-5,
                 row_tile=None, ff_tile=None, vmem_budget=None):
    """x: (B, S, E).  w1: (E, F) pre-transposed, b1: (F,), w2: (F, E), b2/gamma/beta: (E,)."""
    batch, seq, embed = x.shape
    ff_dim = w1.shape[1]
    M = batch * seq

    # Lane-dense padding: keep e_pad == embed when it is already 128-aligned (common case)
    # so the wrapper pad / final slice fold away.
    e_pad = embed if embed % 128 == 0 else _round_up(embed, 128)
    f_pad = _round_up(ff_dim, 128)

    vmem_cap = _vmem_capacity_bytes()
    if vmem_budget is None:
        vmem_budget = (vmem_cap * 3) // 4          # leave headroom for compiler scratch
    vmem_limit = (vmem_cap * 7) // 8               # never request the full physical VMEM

    in_bytes = jnp.dtype(x.dtype).itemsize
    out_dtype = x.dtype
    out_bytes = jnp.dtype(out_dtype).itemsize

    split_rows = vmem_cap <= (64 << 20)            # v7x-like: 2 TCs per chip
    tm, tf = _select_tiles(M, e_pad, f_pad, in_bytes, out_bytes, vmem_budget, split_rows)
    if row_tile is not None:
        tm = min(_round_up(row_tile, 8), _round_up(M, 8))
    if ff_tile is not None:
        tf = min(_round_up(ff_tile, 128), f_pad)

    m_pad = _round_up(M, tm)
    f_pad = _round_up(f_pad, tf)
    single_pass = (tf == f_pad)

    # Host-side packing / padding (zeros in padded lanes keep the in-kernel LN exact).
    x2d = jnp.pad(x.reshape(M, embed), ((0, m_pad - M), (0, e_pad - embed)))
    w1_p = jnp.pad(w1, ((0, e_pad - embed), (0, f_pad - ff_dim))).astype(jnp.bfloat16)
    b1_p = jnp.pad(b1, (0, f_pad - ff_dim)).reshape(1, f_pad).astype(jnp.float32)
    w2_p = jnp.pad(w2, ((0, f_pad - ff_dim), (0, e_pad - embed))).astype(jnp.bfloat16)
    b2_p = jnp.pad(b2, (0, e_pad - embed)).reshape(1, e_pad).astype(jnp.float32)
    gamma_p = jnp.pad(gamma, (0, e_pad - embed)).reshape(1, e_pad).astype(jnp.float32)
    beta_p = jnp.pad(beta, (0, e_pad - embed)).reshape(1, e_pad).astype(jnp.float32)

    n_row_tiles = m_pad // tm
    weight_passes = 1 if single_pass else n_row_tiles   # weights re-streamed per row tile
    cost = pl.CostEstimate(
        flops=4 * m_pad * e_pad * f_pad,                 # two matmuls: 2*M*E*F each
        transcendentals=m_pad,                           # rsqrt per row
        bytes_accessed=m_pad * e_pad * (in_bytes + out_bytes)
        + weight_passes * 2 * e_pad * f_pad * 2          # bf16 w1 + w2 streams
        + weight_passes * (f_pad + 3 * e_pad) * 4,       # biases / gamma / beta
    )

    if single_pass:
        out = pl.pallas_call(
            functools.partial(_ffn_single_kernel, eps=eps, embed_actual=embed),
            out_shape=jax.ShapeDtypeStruct((m_pad, e_pad), out_dtype),
            grid_spec=pltpu.PrefetchScalarGridSpec(
                num_scalar_prefetch=0,
                grid=(m_pad // tm,),
                in_specs=[
                    pl.BlockSpec((tm, e_pad), lambda i: (i, 0)),      # x rows
                    pl.BlockSpec((e_pad, f_pad), lambda i: (0, 0)),   # W1^T (bf16, resident)
                    pl.BlockSpec((1, f_pad), lambda i: (0, 0)),       # b1
                    pl.BlockSpec((f_pad, e_pad), lambda i: (0, 0)),   # W2^T (bf16, resident)
                    pl.BlockSpec((1, e_pad), lambda i: (0, 0)),       # b2
                    pl.BlockSpec((1, e_pad), lambda i: (0, 0)),       # gamma
                    pl.BlockSpec((1, e_pad), lambda i: (0, 0)),       # beta
                ],
                out_specs=pl.BlockSpec((tm, e_pad), lambda i: (i, 0)),
            ),
            compiler_params=pltpu.CompilerParams(
                dimension_semantics=("parallel",),
                vmem_limit_bytes=vmem_limit,
            ),
            cost_estimate=cost,
        )(x2d, w1_p, b1_p, w2_p, b2_p, gamma_p, beta_p)
    else:
        out = pl.pallas_call(
            functools.partial(_ffn_ktiled_kernel, eps=eps, embed_actual=embed),
            out_shape=jax.ShapeDtypeStruct((m_pad, e_pad), out_dtype),
            grid_spec=pltpu.PrefetchScalarGridSpec(
                num_scalar_prefetch=0,
                grid=(m_pad // tm, f_pad // tf),
                in_specs=[
                    pl.BlockSpec((tm, e_pad), lambda i, k: (i, 0)),   # x rows (resident over k)
                    pl.BlockSpec((e_pad, tf), lambda i, k: (0, k)),   # W1^T chunk (bf16)
                    pl.BlockSpec((1, tf), lambda i, k: (0, k)),       # b1 chunk
                    pl.BlockSpec((tf, e_pad), lambda i, k: (k, 0)),   # W2^T chunk (bf16)
                    pl.BlockSpec((1, e_pad), lambda i, k: (0, 0)),    # b2
                    pl.BlockSpec((1, e_pad), lambda i, k: (0, 0)),    # gamma
                    pl.BlockSpec((1, e_pad), lambda i, k: (0, 0)),    # beta
                ],
                out_specs=pl.BlockSpec((tm, e_pad), lambda i, k: (i, 0)),
                scratch_shapes=[
                    pltpu.VMEM((tm, e_pad), jnp.float32),    # f32 accumulator (bias+residual init)
                    pltpu.VMEM((tm, e_pad), jnp.bfloat16),   # hoisted bf16 copy of x
                ],
            ),
            compiler_params=pltpu.CompilerParams(
                dimension_semantics=("parallel", "arbitrary"),
                vmem_limit_bytes=vmem_limit,
            ),
            cost_estimate=cost,
        )(x2d, w1_p, b1_p, w2_p, b2_p, gamma_p, beta_p)

    return out[:M, :embed].reshape(batch, seq, embed)


# ---------------------------------------------------------------------------
# References
# ---------------------------------------------------------------------------

def feed_forward_ref_f32(x, w1, b1, w2, b2, gamma, beta, eps=1e-5):
    h = jnp.maximum(x @ w1 + b1, 0.0)
    y = h @ w2 + b2 + x
    mean = jnp.mean(y, axis=-1, keepdims=True)
    var = jnp.mean((y - mean) ** 2, axis=-1, keepdims=True)
    return (y - mean) * jax.lax.rsqrt(var + eps) * gamma + beta


def feed_forward_ref_bf16(x, w1, b1, w2, b2, gamma, beta, eps=1e-5):
    # Mirrors the kernel's bf16-matmul / f32-accumulate convention.
    xb = x.astype(jnp.bfloat16)
    h = jnp.dot(xb, w1.astype(jnp.bfloat16), preferred_element_type=jnp.float32) + b1
    h = jnp.maximum(h, 0.0)
    y = jnp.dot(h.astype(jnp.bfloat16), w2.astype(jnp.bfloat16),
                preferred_element_type=jnp.float32) + b2 + x
    mean = jnp.mean(y, axis=-1, keepdims=True)
    var = jnp.mean((y - mean) ** 2, axis=-1, keepdims=True)
    return (y - mean) * jax.lax.rsqrt(var + eps) * gamma + beta


if __name__ == "__main__":
    batch, seq, embed, ff_dim = 2, 8, 32, 64

    key = jax.random.PRNGKey(0)
    kx, k1, kb1, k2, kb2 = jax.random.split(key, 5)

    x = jax.random.normal(kx, (batch, seq, embed), dtype=jnp.float32)

    # Deterministic parameter init (Linear-like uniform ranges); stored pre-transposed.
    bound1 = 1.0 / (embed ** 0.5)
    w1 = jax.random.uniform(k1, (embed, ff_dim), jnp.float32, -bound1, bound1)
    b1 = jax.random.uniform(kb1, (ff_dim,), jnp.float32, -bound1, bound1)
    bound2 = 1.0 / (ff_dim ** 0.5)
    w2 = jax.random.uniform(k2, (ff_dim, embed), jnp.float32, -bound2, bound2)
    b2 = jax.random.uniform(kb2, (embed,), jnp.float32, -bound2, bound2)
    gamma = jnp.ones((embed,), jnp.float32)   # LayerNorm weight
    beta = jnp.zeros((embed,), jnp.float32)   # LayerNorm bias

    # 1) Auto-tiled path (for these shapes: single-pass fast path).
    out = jax.block_until_ready(feed_forward(x, w1, b1, w2, b2, gamma, beta))
    assert out.shape == (batch, seq, embed)
    ref_bf16 = feed_forward_ref_bf16(x, w1, b1, w2, b2, gamma, beta)
    assert jnp.allclose(out, ref_bf16, atol=1e-4, rtol=1e-4), "mismatch vs bf16 reference"
    ref_f32 = feed_forward_ref_f32(x, w1, b1, w2, b2, gamma, beta)
    assert jnp.allclose(out, ref_f32, atol=5e-2, rtol=5e-2), "mismatch vs f32 reference"

    # 2) Force the k-tiled accumulator path (ff_tile < padded ff_dim) to exercise it too.
    ff_dim2 = 256
    k3, kb3, k4, kb4 = jax.random.split(jax.random.PRNGKey(1), 4)
    w1b = jax.random.uniform(k3, (embed, ff_dim2), jnp.float32, -bound1, bound1)
    b1b = jax.random.uniform(kb3, (ff_dim2,), jnp.float32, -bound1, bound1)
    bound2b = 1.0 / (ff_dim2 ** 0.5)
    w2b = jax.random.uniform(k4, (ff_dim2, embed), jnp.float32, -bound2b, bound2b)
    b2b = jax.random.uniform(kb4, (embed,), jnp.float32, -bound2b, bound2b)

    out2 = jax.block_until_ready(
        feed_forward(x, w1b, b1b, w2b, b2b, gamma, beta, ff_tile=128))
    ref2 = feed_forward_ref_bf16(x, w1b, b1b, w2b, b2b, gamma, beta)
    assert jnp.allclose(out2, ref2, atol=1e-4, rtol=1e-4), "k-tiled path mismatch"

    print("KERNEL_OK")
</pallas_src>

<mosaic_0001>
module attributes {stable_mosaic.version = 11 : i64} {
  func.func @_ffn_single_kernel(%arg0: i32, %arg1: memref<16x128xf32, #tpu.memory_space<vmem>>, %arg2: memref<128x128xbf16, #tpu.memory_space<vmem>>, %arg3: memref<1x128xf32, #tpu.memory_space<vmem>>, %arg4: memref<128x128xbf16, #tpu.memory_space<vmem>>, %arg5: memref<1x128xf32, #tpu.memory_space<vmem>>, %arg6: memref<1x128xf32, #tpu.memory_space<vmem>>, %arg7: memref<1x128xf32, #tpu.memory_space<vmem>>, %arg8: memref<16x128xf32, #tpu.memory_space<vmem>>) attributes {dimension_semantics = [#tpu.dimension_semantics<parallel>], iteration_bounds = array<i64: 1>, scalar_prefetch = 0 : i64, scratch_operands = 0 : i64, tpu.core_type = #tpu.core_type<tc>, window_params = [{transform_indices = @transform_0, window_bounds = array<i64: 16, 128>}, {pipeline_mode = #tpu.pipeline_mode<synchronous>, transform_indices = @transform_1, window_bounds = array<i64: 128, 128>}, {pipeline_mode = #tpu.pipeline_mode<synchronous>, transform_indices = @transform_2, window_bounds = array<i64: 1, 128>}, {pipeline_mode = #tpu.pipeline_mode<synchronous>, transform_indices = @transform_3, window_bounds = array<i64: 128, 128>}, {pipeline_mode = #tpu.pipeline_mode<synchronous>, transform_indices = @transform_4, window_bounds = array<i64: 1, 128>}, {pipeline_mode = #tpu.pipeline_mode<synchronous>, transform_indices = @transform_5, window_bounds = array<i64: 1, 128>}, {pipeline_mode = #tpu.pipeline_mode<synchronous>, transform_indices = @transform_6, window_bounds = array<i64: 1, 128>}, {transform_indices = @transform_7, window_bounds = array<i64: 16, 128>}]} {
    %c0 = arith.constant 0 : index
    %c0_0 = arith.constant 0 : index
    %0 = vector.load %arg1[%c0, %c0_0] : memref<16x128xf32, #tpu.memory_space<vmem>>, vector<16x128xf32>
    %1 = arith.truncf %0 : vector<16x128xf32> to vector<16x128xbf16>
    %c0_1 = arith.constant 0 : index
    %c0_2 = arith.constant 0 : index
    %2 = vector.load %arg2[%c0_1, %c0_2] : memref<128x128xbf16, #tpu.memory_space<vmem>>, vector<128x128xbf16>
    %cst = arith.constant dense<0.000000e+00> : vector<16x128xf32>
    %3 = tpu.matmul %1, %2, %cst {dimension_numbers = #tpu.dot_dimension_numbers<[1], [0], [0], [1], [0, 0, 1, 1], [], []>} : vector<16x128xbf16>, vector<128x128xbf16>, vector<16x128xf32> -> vector<16x128xf32>
    %c0_3 = arith.constant 0 : index
    %c0_4 = arith.constant 0 : index
    %4 = vector.load %arg3[%c0_3, %c0_4] : memref<1x128xf32, #tpu.memory_space<vmem>>, vector<1x128xf32>
    %5 = vector.broadcast %4 : vector<1x128xf32> to vector<16x128xf32>
    %6 = arith.addf %3, %5 : vector<16x128xf32>
    %cst_5 = arith.constant 0.000000e+00 : f32
    %7 = vector.broadcast %cst_5 : f32 to vector<16x128xf32>
    %8 = arith.maximumf %6, %7 : vector<16x128xf32>
    %9 = arith.truncf %8 : vector<16x128xf32> to vector<16x128xbf16>
    %c0_6 = arith.constant 0 : index
    %c0_7 = arith.constant 0 : index
    %10 = vector.load %arg4[%c0_6, %c0_7] : memref<128x128xbf16, #tpu.memory_space<vmem>>, vector<128x128xbf16>
    %cst_8 = arith.constant dense<0.000000e+00> : vector<16x128xf32>
    %11 = tpu.matmul %9, %10, %cst_8 {dimension_numbers = #tpu.dot_dimension_numbers<[1], [0], [0], [1], [0, 0, 1, 1], [], []>} : vector<16x128xbf16>, vector<128x128xbf16>, vector<16x128xf32> -> vector<16x128xf32>
    %c0_9 = arith.constant 0 : index
    %c0_10 = arith.constant 0 : index
    %12 = vector.load %arg5[%c0_9, %c0_10] : memref<1x128xf32, #tpu.memory_space<vmem>>, vector<1x128xf32>
    %13 = vector.broadcast %12 : vector<1x128xf32> to vector<16x128xf32>
    %14 = arith.addf %11, %13 : vector<16x128xf32>
    %15 = arith.addf %14, %0 : vector<16x128xf32>
    %c0_11 = arith.constant 0 : index
    %c0_12 = arith.constant 0 : index
    %16 = vector.load %arg6[%c0_11, %c0_12] : memref<1x128xf32, #tpu.memory_space<vmem>>, vector<1x128xf32>
    %c0_13 = arith.constant 0 : index
    %c0_14 = arith.constant 0 : index
    %17 = vector.load %arg7[%c0_13, %c0_14] : memref<1x128xf32, #tpu.memory_space<vmem>>, vector<1x128xf32>
    %cst_15 = arith.constant dense<0.000000e+00> : vector<16xf32>
    %18 = vector.multi_reduction <add>, %15, %cst_15 [1] : vector<16x128xf32> to vector<16xf32>
    %19 = vector.shape_cast %18 : vector<16xf32> to vector<16x1xf32>
    %cst_16 = arith.constant 3.125000e-02 : f32
    %20 = vector.broadcast %cst_16 : f32 to vector<16x1xf32>
    %21 = arith.mulf %19, %20 : vector<16x1xf32>
    %22 = vector.broadcast %21 : vector<16x1xf32> to vector<16x128xf32>
    %23 = arith.subf %15, %22 : vector<16x128xf32>
    %24 = tpu.iota {dimensions = array<i32: 1>} : vector<16x128xi32>
    %c32_i32 = arith.constant 32 : i32
    %25 = vector.broadcast %c32_i32 : i32 to vector<16x128xi32>
    %26 = arith.cmpi slt, %24, %25 : vector<16x128xi32>
    %cst_17 = arith.constant 0.000000e+00 : f32
    %27 = vector.broadcast %cst_17 : f32 to vector<16x128xf32>
    %28 = arith.select %26, %23, %27 : vector<16x128xi1>, vector<16x128xf32>
    %29 = arith.mulf %28, %28 : vector<16x128xf32>
    %cst_18 = arith.constant dense<0.000000e+00> : vector<16xf32>
    %30 = vector.multi_reduction <add>, %29, %cst_18 [1] : vector<16x128xf32> to vector<16xf32>
    %31 = vector.shape_cast %30 : vector<16xf32> to vector<16x1xf32>
    %cst_19 = arith.constant 3.125000e-02 : f32
    %32 = vector.broadcast %cst_19 : f32 to vector<16x1xf32>
    %33 = arith.mulf %31, %32 : vector<16x1xf32>
    %cst_20 = arith.constant 9.99999974E-6 : f32
    %34 = vector.broadcast %cst_20 : f32 to vector<16x1xf32>
    %35 = arith.addf %33, %34 : vector<16x1xf32>
    %36 = math.rsqrt %35 : vector<16x1xf32>
    %37 = vector.broadcast %36 : vector<16x1xf32> to vector<16x128xf32>
    %38 = arith.mulf %28, %37 : vector<16x128xf32>
    %39 = vector.broadcast %16 : vector<1x128xf32> to vector<16x128xf32>
    %40 = arith.mulf %38, %39 : vector<16x128xf32>
    %41 = vector.broadcast %17 : vector<1x128xf32> to vector<16x128xf32>
    %42 = arith.addf %40, %41 : vector<16x128xf32>
    %c0_21 = arith.constant 0 : index
    %c0_22 = arith.constant 0 : index
    %43 = vector.load %arg8[%c0_21, %c0_22] : memref<16x128xf32, #tpu.memory_space<vmem>>, vector<16x128xf32>
    tpu.vector_store %arg8[%c0_21, %c0_22], %42 {strides = array<i32>} : memref<16x128xf32, #tpu.memory_space<vmem>>, vector<16x128xf32>,
    return
  }
  func.func @transform_0(%arg0: i32) -> (i32, i32) {
    %c0_i32 = arith.constant 0 : i32
    %c0_i32_0 = arith.constant 0 : i32
    return %arg0, %c0_i32 : i32, i32
  }
  func.func @transform_1(%arg0: i32) -> (i32, i32) {
    %c0_i32 = arith.constant 0 : i32
    %c0_i32_0 = arith.constant 0 : i32
    %c0_i32_1 = arith.constant 0 : i32
    return %c0_i32, %c0_i32_0 : i32, i32
  }
  func.func @transform_2(%arg0: i32) -> (i32, i32) {
    %c0_i32 = arith.constant 0 : i32
    %c0_i32_0 = arith.constant 0 : i32
    %c0_i32_1 = arith.constant 0 : i32
    return %c0_i32, %c0_i32_0 : i32, i32
  }
  func.func @transform_3(%arg0: i32) -> (i32, i32) {
    %c0_i32 = arith.constant 0 : i32
    %c0_i32_0 = arith.constant 0 : i32
    %c0_i32_1 = arith.constant 0 : i32
    return %c0_i32, %c0_i32_0 : i32, i32
  }
  func.func @transform_4(%arg0: i32) -> (i32, i32) {
    %c0_i32 = arith.constant 0 : i32
    %c0_i32_0 = arith.constant 0 : i32
    %c0_i32_1 = arith.constant 0 : i32
    return %c0_i32, %c0_i32_0 : i32, i32
  }
  func.func @transform_5(%arg0: i32) -> (i32, i32) {
    %c0_i32 = arith.constant 0 : i32
    %c0_i32_0 = arith.constant 0 : i32
    %c0_i32_1 = arith.constant 0 : i32
    return %c0_i32, %c0_i32_0 : i32, i32
  }
  func.func @transform_6(%arg0: i32) -> (i32, i32) {
    %c0_i32 = arith.constant 0 : i32
    %c0_i32_0 = arith.constant 0 : i32
    %c0_i32_1 = arith.constant 0 : i32
    return %c0_i32, %c0_i32_0 : i32, i32
  }
  func.func @transform_7(%arg0: i32) -> (i32, i32) {
    %c0_i32 = arith.constant 0 : i32
    %c0_i32_0 = arith.constant 0 : i32
    return %arg0, %c0_i32 : i32, i32
  }
}

</mosaic_0001>

<bundles_post_ra>
// kernel: tpu_custom_call.1
= control target key start
LH: loop header
LB: loop body
LE: loop exit
PB: predicated region body
PF: predicated region fallthrough
CT: control target
= control target key end

     0   :  { %12 = vsyncpa [#allocation3], 0  ;;  %s690_s0 = inlined_call_operand.hbm [shape: f32[16,128], index: 0, kind: input, shape index: {}]   ;;  %s691_s1 = inlined_call_operand.hbm [shape: bf16[128,128], index: 1, kind: input, shape index: {}]   ;;  %s692_s2 = inlined_call_operand.vmem [shape: f32[1,128], index: 2, kind: input, shape index: {}]   ;;  %s693_s3 = inlined_call_operand.hbm [shape: bf16[128,128], index: 3, kind: input, shape index: {}]   ;;  %s694_s4 = inlined_call_operand.vmem [shape: f32[1,128], index: 4, kind: input, shape index: {}]   ;;  %s695_s5 = inlined_call_operand.vmem [shape: f32[1,128], index: 5, kind: input, shape index: {}]   ;;  %s696_s6 = inlined_call_operand.vmem [shape: f32[1,128], index: 6, kind: input, shape index: {}]   ;;  %s697_s7 = inlined_call_operand.hbm [shape: f32[16,128], index: 7, kind: output, shape index: {}]  }
   0x1   :  { %13 = vsyncpa [#allocation6], 0 }
   0x2   :  { %14 = vsyncpa [#allocation4], 0  ;;  %s568_s24 = smov [#allocation5]   ;;  %s474_s28 = scalar_lea.hbm %s691_s1, 1024 }
   0x3   :  { %s32_s25 = sshll.u32 %s568_s24, 4  ;;  %p475_p0 = scmp.ne.s32.totalorder %s691_s1, %s474_s28  ;;  %s33_s25 = int_to_ptr.vmem [resolvable:$true] %s32_s25 }
   0x4   :  { %p478_p1 = scmp.lt.u32.totalorder %s474_s28, %s691_s1 }
   0x6   :  { %p480_p2 = pnand %p478_p1, %p475_p0 }
   0x8   :  { %483 = shalt.err (!%p480_p2)
}
   0x9   :  { %s484_s10 = scalar_lea.vmem %s33_s25, 1024  ;;  %p489_p4 = scmp.lt.s32.totalorder %s33_s25, %s33_s25 }
   0xa   :  { %p485_p3 = scmp.ne.s32.totalorder %s33_s25, %s484_s10  ;;  %p490_p5 = scmp.lt.s32.totalorder %s484_s10, %s484_s10 }
   0xc   :  { %p491_p6 = por %p490_p5, %p489_p4 }
   0xe   :  { %p492_p7 = pnand %p491_p6, %p485_p3 }
  0x10   :  { %495 = shalt.err (!%p492_p7)
}
  0x11   :  { %s569_s11 = smov 64   ;;  %s570_s12 = smov 4  }
  0x12   :  { %38 = dma.hbm_to_vmem [thread:$0]  %s691_s1, 1024, %s33_s25, [#allocation6], %s569_s11, %s569_s11, %s570_s12  }
  0x13   :  { %s571_s15 = smov [#allocation2]   ;;  %s496_s19 = scalar_lea.hbm %s690_s0, 256 }
  0x14   :  { %s20_s16 = sshll.u32 %s571_s15, 4  ;;  %p497_p8 = scmp.ne.s32.totalorder %s690_s0, %s496_s19  ;;  %s21_s16 = int_to_ptr.vmem [resolvable:$true] %s20_s16 }
  0x15   :  { %p500_p9 = scmp.lt.u32.totalorder %s496_s19, %s690_s0 }
  0x17   :  { %p502_p10 = pnand %p500_p9, %p497_p8 }
  0x19   :  { %505 = shalt.err (!%p502_p10)
}
  0x1a   :  { %s506_s24 = scalar_lea.vmem %s21_s16, 256  ;;  %p511_p12 = scmp.lt.s32.totalorder %s21_s16, %s21_s16 }
  0x1b   :  { %p507_p11 = scmp.ne.s32.totalorder %s21_s16, %s506_s24  ;;  %p512_p13 = scmp.lt.s32.totalorder %s506_s24, %s506_s24 }
  0x1d   :  { %p513_p0 = por %p512_p13, %p511_p12 }
  0x1f   :  { %p514_p1 = pnand %p513_p0, %p507_p11 }
  0x21   :  { %517 = shalt.err (!%p514_p1)
}
  0x22   :  { %s572_s1 = smov 128   ;;  %s573_s25 = smov 8  }
  0x23   :  { %26 = dma.hbm_to_vmem [thread:$0]  %s690_s0, 256, %s21_s16, [#allocation3], %s572_s1, %s572_s1, %s573_s25  }
  0x24   :  { %s574_s28 = smov [#allocation7]   ;;  %s518_s9 = scalar_lea.hbm %s693_s3, 1024 }
  0x25   :  { %s46_s29 = sshll.u32 %s574_s28, 4  ;;  %p519_p2 = scmp.ne.s32.totalorder %s693_s3, %s518_s9  ;;  %s47_s29 = int_to_ptr.vmem [resolvable:$true] %s46_s29 }
  0x26   :  { %p522_p3 = scmp.lt.u32.totalorder %s518_s9, %s693_s3 }
  0x28   :  { %p524_p4 = pnand %p522_p3, %p519_p2 }
  0x2a   :  { %527 = shalt.err (!%p524_p4)
}
  0x2b   :  { %s528_s17 = scalar_lea.vmem %s47_s29, 1024  ;;  %p533_p6 = scmp.lt.s32.totalorder %s47_s29, %s47_s29 }
  0x2c   :  { %p529_p5 = scmp.ne.s32.totalorder %s47_s29, %s528_s17  ;;  %p534_p7 = scmp.lt.s32.totalorder %s528_s17, %s528_s17 }
  0x2e   :  { %p535_p8 = por %p534_p7, %p533_p6 }
  0x30   :  { %p536_p9 = pnand %p535_p8, %p529_p5 }
  0x32   :  { %539 = shalt.err (!%p536_p9)
}
  0x33   :  { %52 = dma.hbm_to_vmem [thread:$0]  %s693_s3, 1024, %s47_s29, [#allocation6], %s569_s11, %s569_s11, %s570_s12  }
  0x34   :  { %562 = dma.done.wait [#allocation3], 256  }
  0x35   :  { %563 = vsyncadd [#allocation3], 4294967040 }
  0x36   :  { %564 = dma.done.wait [#allocation6], 2048  }
  0x37   :  { %565 = vsyncadd [#allocation6], 4294965248  ;;  %v575_v0 = vmov 0.0   ;;  %vm576_vm0 = vmmov 0   ;;  %v454_v1 = vld [vmem:[#allocation5] sm:$0xff]   ;;  %v455_v2 = vld [vmem:[#allocation5 + $0x8] sm:$0xff]   ;;  %v311_v39 = vlaneseq }
  0x38   :  { %404 = vmatprep.subr.bf16.mxu0 %v575_v0  ;;  %420 = vmatprep.mubr.msk.bf16.mxu0 %vm576_vm0, %v575_v0  ;;  %v456_v3 = vld [vmem:[#allocation5 + $0x10] sm:$0xff]   ;;  %v462_v4 = vld [vmem:[#allocation7] sm:$0xff]   ;;  %v457_v5 = vld [vmem:[#allocation5 + $0x18] sm:$0xff]   ;;  %s577_s21 = smov [#allocation8]  }
  0x39   :  { %424 = vmatprep.subr.bf16.mxu1 %v575_v0  ;;  %440 = vmatprep.mubr.msk.bf16.mxu1 %vm576_vm0, %v575_v0  ;;  %v463_v6 = vld [vmem:[#allocation7 + $0x8] sm:$0xff]   ;;  %v458_v7 = vld [vmem:[#allocation5 + $0x20] sm:$0xff]   ;;  %v464_v8 = vld [vmem:[#allocation7 + $0x10] sm:$0xff]   ;;  %v312_v40 = vand.u32 127, %v311_v39  ;;  %s353_s22 = sshll.u32 %s577_s21, 4  ;;  %s354_s22 = int_to_ptr.vmem [resolvable:$true] %s353_s22 }
  0x3a   :  { %405 = vmatpush3.bf16.msra.mxu0 %v454_v1  ;;  %425 = vmatpush3.bf16.msra.mxu1 %v462_v4  ;;  %v459_v9 = vld [vmem:[#allocation5 + $0x28] sm:$0xff]   ;;  %v465_v10 = vld [vmem:[#allocation7 + $0x18] sm:$0xff]   ;;  %v460_v11 = vld [vmem:[#allocation5 + $0x30] sm:$0xff]   ;;  %s540_s23 = scalar_lea.vmem %s354_s22, 256  ;;  %p545_p11 = scmp.lt.s32.totalorder %s354_s22, %s354_s22 }
  0x3b   :  { %406 = vmatprep.subr.bf16.mxu0 %v575_v0  ;;  %426 = vmatprep.subr.bf16.mxu1 %v575_v0  ;;  %v466_v12 = vld [vmem:[#allocation7 + $0x20] sm:$0xff]   ;;  %v461_v13 = vld [vmem:[#allocation5 + $0x38] sm:$0xff]   ;;  %v69_v14 = vld [vmem:[#allocation2] sm:$0xff]  ;;  %vm313_vm1 = vcmp.lt.s32.totalorder %v312_v40, 32  ;;  %p541_p10 = scmp.ne.s32.totalorder %s354_s22, %s540_s23  ;;  %p546_p12 = scmp.lt.s32.totalorder %s540_s23, %s540_s23 }
  0x3c   :  { %v70_v15 = vld [vmem:[#allocation2 + $0x8] sm:$0xff]  ;;  %v467_v16 = vld [vmem:[#allocation7 + $0x28] sm:$0xff]   ;;  %v468_v18 = vld [vmem:[#allocation7 + $0x30] sm:$0xff]  }
  0x3d   :  { %v71_v17 = vpack.c.bf16 %v70_v15, %v69_v14  ;;  %v469_v19 = vld [vmem:[#allocation7 + $0x38] sm:$0xff]   ;;  %v366_v20 = vld [vmem:[%s692_s2] ss:$0 sm:$0xff]  ;;  %p547_p13 = por %p546_p12, %p545_p11 }
  0x3e   :  { %407 = vmatpush3.bf16.msra.mxu0 %v455_v2  ;;  %427 = vmatpush3.bf16.msra.mxu1 %v463_v6  ;;  %v375_v30 = vld [vmem:[%s694_s4] ss:$0 sm:$0xff] }
  0x3f   :  { %408 = vmatprep.subr.bf16.mxu0 %v575_v0  ;;  %428 = vmatprep.subr.bf16.mxu1 %v575_v0  ;;  %v384_v58 = vld [vmem:[%s695_s5] ss:$0 sm:$0xff]  ;;  %p548_p0 = pnand %p547_p13, %p541_p10 }
  0x40   :  { %v385_v60 = vld [vmem:[%s696_s6] ss:$0 sm:$0xff] }
  0x42   :  { %409 = vmatpush3.bf16.msra.mxu0 %v456_v3  ;;  %429 = vmatpush3.bf16.msra.mxu1 %v464_v8 }
  0x43   :  { %410 = vmatprep.subr.bf16.mxu0 %v575_v0  ;;  %430 = vmatprep.subr.bf16.mxu1 %v575_v0 }
  0x46   :  { %411 = vmatpush3.bf16.msra.mxu0 %v457_v5  ;;  %431 = vmatpush3.bf16.msra.mxu1 %v465_v10 }
  0x47   :  { %412 = vmatprep.subr.bf16.mxu0 %v575_v0  ;;  %432 = vmatprep.subr.bf16.mxu1 %v575_v0 }
  0x4a   :  { %413 = vmatpush3.bf16.msra.mxu0 %v458_v7  ;;  %433 = vmatpush3.bf16.msra.mxu1 %v466_v12 }
  0x4b   :  { %414 = vmatprep.subr.bf16.mxu0 %v575_v0  ;;  %434 = vmatprep.subr.bf16.mxu1 %v575_v0 }
  0x4e   :  { %415 = vmatpush3.bf16.msra.mxu0 %v459_v9  ;;  %435 = vmatpush3.bf16.msra.mxu1 %v467_v16 }
  0x4f   :  { %416 = vmatprep.subr.bf16.mxu0 %v575_v0  ;;  %436 = vmatprep.subr.bf16.mxu1 %v575_v0 }
  0x52   :  { %417 = vmatpush3.bf16.msra.mxu0 %v460_v11  ;;  %437 = vmatpush3.bf16.msra.mxu1 %v468_v18 }
  0x53   :  { %418 = vmatprep.subr.bf16.mxu0 %v575_v0  ;;  %438 = vmatprep.subr.bf16.mxu1 %v575_v0 }
  0x56   :  { %419 = vmatpush3.bf16.msra.mxu0 %v461_v13  ;;  %439 = vmatpush3.bf16.msra.mxu1 %v469_v19 }
  0x59   :  { %421 = vmatmul.mubr.bf16.vlgmr.msra.gmra.mrb[0].mxu0 %v71_v17 }
 0x12c   :  { %v177_v21 = vpop.f32.mrb[0].mxu0 }
 0x12d   :  { %v178_v22 = vadd.f32 %v366_v20, %v177_v21  ;;  %v422_v23 = vpop.f32.mrb[1].mxu0 }
 0x12e   :  { %v180_v24 = vpop.f32.mrb[2].mxu0 }
 0x12f   :  { %v181_v25 = vadd.f32 %v366_v20, %v180_v24  ;;  %v423_v26 = vpop.f32.mrb[3].mxu0  ;;  %v184_v27 = vmax.f32 %v178_v22, 0.0 }
 0x131   :  { %v185_v28 = vmax.f32 %v181_v25, 0.0 }
 0x133   :  { %v186_v29 = vpack.c.bf16 %v185_v28, %v184_v27 }
 0x135   :  { %441 = vmatmul.mubr.bf16.vlgmr.msra.gmra.mrb[0].mxu1 %v186_v29 }
 0x208   :  { %v292_v31 = vpop.f32.mrb[0].mxu1 }
 0x209   :  { %v293_v32 = vadd.f32 %v375_v30, %v292_v31  ;;  %v442_v33 = vpop.f32.mrb[1].mxu1 }
 0x20a   :  { %v295_v34 = vpop.f32.mrb[2].mxu1 }
 0x20b   :  { %v296_v35 = vadd.f32 %v375_v30, %v295_v34  ;;  %v443_v36 = vpop.f32.mrb[3].mxu1  ;;  %v299_v37 = vadd.f32 %v293_v32, %v69_v14 }
 0x20d   :  { %303 = vadd.xlane.f32.xlu0 %v299_v37  ;;  %v300_v38 = vadd.f32 %v296_v35, %v70_v15 }
 0x211   :  { %305 = vadd.xlane.f32.xlu0 %v300_v38 }
 0x29a   :  { %v304_v41 = vpop.xlane.xlu0 %303 }
 0x29b   :  { %v307_v42 = vmul.f32 0.03125, %v304_v41 }
 0x29d   :  { %v309_v43 = vsub.f32 %v299_v37, %v307_v42 }
 0x29e   :  { %v306_v44 = vpop.xlane.xlu0 %305 }
 0x29f   :  { %v308_v45 = vmul.f32 0.03125, %v306_v44  ;;  %v314_v46 = vsel %vm313_vm1, %v309_v43, 0.0 }
 0x2a0   :  { %v316_v47 = vmul.f32 %v314_v46, %v314_v46 }
 0x2a1   :  { %v310_v48 = vsub.f32 %v300_v38, %v308_v45 }
 0x2a2   :  { %318 = vadd.xlane.f32.xlu1 %v316_v47 }
 0x2a3   :  { %v315_v49 = vsel %vm313_vm1, %v310_v48, 0.0 }
 0x2a4   :  { %v317_v50 = vmul.f32 %v315_v49, %v315_v49 }
 0x2a6   :  { %320 = vadd.xlane.f32.xlu1 %v317_v50 }
 0x32f   :  { %v319_v51 = vpop.xlane.xlu1 %318 }
 0x330   :  { %v322_v52 = vmul.f32 0.03125, %v319_v51 }
 0x332   :  { %v324_v53 = vadd.f32 1e-05, %v322_v52 }
 0x333   :  { %v321_v54 = vpop.xlane.xlu1 %320 }
 0x334   :  { %470 = vrsqrt.f32 %v324_v53  ;;  %v323_v55 = vmul.f32 0.03125, %v321_v54 }
 0x336   :  { %v325_v56 = vadd.f32 1e-05, %v323_v55 }
 0x338   :  { %472 = vrsqrt.f32 %v325_v56 }
 0x33e   :  { %v471_v57 = vpop.eup %470 }
 0x33f   :  { %v328_v59 = vmul.f32 %v471_v57, %v314_v46 }
 0x341   :  { %v336_v61 = vmul.f32 %v384_v58, %v328_v59 }
 0x342   :  { %v473_v62 = vpop.eup %472 }
 0x343   :  { %v329_v63 = vmul.f32 %v473_v62, %v315_v49  ;;  %v344_v0 = vadd.f32 %v385_v60, %v336_v61 }
 0x345   :  { %v337_v1 = vmul.f32 %v384_v58, %v329_v63  ;;  %346 = vst [vmem:[#allocation8] sm:$0xff] %v344_v0 }
 0x347   :  { %v345_v2 = vadd.f32 %v385_v60, %v337_v1 }
 0x349   :  { %347 = vst [vmem:[#allocation8 + $0x8] sm:$0xff] %v345_v2 }
 0x34a   :  { %551 = shalt.err (!%p548_p0)
}
 0x34b   :  { %s552_s24 = scalar_lea.hbm %s697_s7, 256 }
 0x34c   :  { %p553_p1 = scmp.ne.s32.totalorder %s697_s7, %s552_s24  ;;  %p556_p2 = scmp.lt.u32.totalorder %s552_s24, %s697_s7 }
 0x34e   :  { %p558_p3 = pnand %p556_p2, %p553_p1 }
 0x350   :  { %561 = shalt.err (!%p558_p3)
}
 0x351   :  { %359 = dma.vmem_to_hbm [thread:$0]  %s354_s22, 256, %s697_s7, [#allocation4], %s572_s1, %s572_s1, %s573_s25  }
 0x352   :  { %566 = dma.done.wait [#allocation4], 256  }
 0x353   :  { %567 = vsyncadd [#allocation4], 4294967040 }
 0x354   :  { %363 = vsyncpa [#allocation3], 1 }
 0x355   :  { %364 = vsyncpa [#allocation6], 1 }
 0x356   :  { %365 = vsyncpa [#allocation4], 1 }

</bundles_post_ra>
